<compile_context>
chip_gen: v7x
topology: tpu7x:2x2x1
jax: 0.10.0
libtpu: 0.0.40
codegen_flags: <defaults>
</compile_context>

<pallas_src>
import jax
import jax.numpy as jnp
from jax.experimental import pallas as pl
from jax.experimental.pallas import tpu as pltpu

NUM_CLASSES = 10      # real logits
OUT_PAD = 128         # lane-dense padded output width
GRAN = 16             # batch-tile granularity: multiple of 16 keeps both the
                      # f32 input (8-sublane) and packed bf16 output
                      # (16-sublane) block layouts legal.


def _round_up(x, m):
    return (x + m - 1) // m * m


def _choose_batch_tiling(B, tile_b):
    """Pick (tb, B_pad): tb multiple of GRAN, minimal padding, even #tiles when cheap."""
    tile_b = max(GRAN, tile_b // GRAN * GRAN)
    Bp = _round_up(B, GRAN)
    n = Bp // GRAN
    divs = [GRAN * d for d in range(1, n + 1) if n % d == 0 and GRAN * d <= tile_b]
    even = [t for t in divs if (Bp // t) % 2 == 0]   # even #tiles -> both v7x TCs busy
    best = max(even) if even else max(divs)
    if Bp <= tile_b or best >= min(tile_b, 256):
        return best, Bp                              # exact divisor, <=15 padded rows
    # All exact divisors are tiny (Bp/GRAN ~ prime): accept a little tile padding,
    # choosing the tile in [256, tile_b] that minimizes padded rows (prefer larger tb).
    lo = min(256, tile_b)
    tb = min(range(lo, tile_b + 1, GRAN), key=lambda t: (_round_up(Bp, t), -t))
    return tb, _round_up(Bp, tb)


def _mlp_softmax_kernel(x_ref, w5_ref, w6_ref, w7_ref, w8_ref, mask_ref, o_ref):
    # x:    [tb, in_feats] f32 -> cast to bf16 here (fused cast, one HBM read)
    # w5:   [in, 256]  w6: [256, 128]  w7: [128, 64]  w8: [64, 128] bf16
    #       (w8 columns >= NUM_CLASSES are zero)
    # mask: [1, 128] f32 additive bias: 0 for real classes, -1e30 for pad cols
    x = x_ref[...].astype(jnp.bfloat16)
    h = jnp.maximum(
        jnp.dot(x, w5_ref[...], preferred_element_type=jnp.float32), 0.0)
    h = jnp.maximum(
        jnp.dot(h.astype(jnp.bfloat16), w6_ref[...],
                preferred_element_type=jnp.float32), 0.0)
    h = jnp.maximum(
        jnp.dot(h.astype(jnp.bfloat16), w7_ref[...],
                preferred_element_type=jnp.float32), 0.0)
    logits = jnp.dot(h.astype(jnp.bfloat16), w8_ref[...],
                     preferred_element_type=jnp.float32)      # [tb, 128] f32

    logits = logits + mask_ref[...]                           # mask padded columns

    m = jnp.max(logits, axis=-1, keepdims=True)
    e = jnp.exp(logits - m)                                   # pad cols -> ~0
    denom = jnp.sum(e, axis=-1, keepdims=True)
    o_ref[...] = (e / denom).astype(o_ref.dtype)              # exact softmax, bf16 store


def cnn_forward(x_nchw, params, tile_b=1024):
    """Forward pass of CNN.forward (flatten + l5..l8 + softmax).

    Conv / dropout / maxpool layers exist in __init__ but are never invoked by
    forward(), so they are intentionally not computed here.
    """
    B = x_nchw.shape[0]
    x = x_nchw.reshape(B, -1)                 # torch.flatten(x, start_dim=1)
    in_feats = x.shape[1]

    tb, B_pad = _choose_batch_tiling(B, tile_b)
    if B_pad != B:
        x = jnp.pad(x, ((0, B_pad - B), (0, 0)))
    nb = B_pad // tb

    w5, w6, w7, w8 = params["w5"], params["w6"], params["w7"], params["w8"]
    mask = params["logit_mask"]

    flops = 2 * B_pad * (in_feats * 256 + 256 * 128 + 128 * 64 + 64 * OUT_PAD)
    bytes_accessed = (B_pad * in_feats * x.dtype.itemsize          # input read
                      + sum(int(w.size) * 2 for w in (w5, w6, w7, w8))
                      + OUT_PAD * 4                                # mask
                      + B_pad * OUT_PAD * 2)                       # bf16 output

    # Resident (constant index_map) inputs: fetched once, stay in VMEM across tiles.
    const = lambda arr: pl.BlockSpec(arr.shape, lambda i: (0, 0))

    out = pl.pallas_call(
        _mlp_softmax_kernel,
        out_shape=jax.ShapeDtypeStruct((B_pad, OUT_PAD), jnp.bfloat16),
        grid=(nb,),
        in_specs=[
            pl.BlockSpec((tb, in_feats), lambda i: (i, 0)),   # pipelined x tiles (f32)
            const(w5),                                        # resident bf16 weights
            const(w6),
            const(w7),
            const(w8),
            const(mask),                                      # [1,128] logit mask
        ],
        out_specs=pl.BlockSpec((tb, OUT_PAD), lambda i: (i, 0)),
        compiler_params=pltpu.CompilerParams(
            dimension_semantics=("parallel",),     # shards batch tiles on v7x
            vmem_limit_bytes=32 << 20,             # safe on v7x (64 MiB phys)
        ),
        cost_estimate=pl.CostEstimate(
            flops=flops,
            transcendentals=B_pad * OUT_PAD,
            bytes_accessed=bytes_accessed),
    )(x, w5, w6, w7, w8, mask)

    return out[:B, :NUM_CLASSES].astype(jnp.float32)


def init_params(key, in_feats, dtype=jnp.bfloat16):
    """Weights stored pre-transposed ([in, out]) in bf16; l8 lane-padded to 128."""
    k5, k6, k7, k8 = jax.random.split(key, 4)

    def lin_t(k, out_f, in_f):
        bound = 1.0 / jnp.sqrt(in_f)
        w = jax.random.uniform(k, (out_f, in_f), jnp.float32,
                               minval=-bound, maxval=bound)
        return w.T.astype(dtype)                    # [in, out]

    w8 = lin_t(k8, NUM_CLASSES, 64)                 # [64, 10]
    w8 = jnp.pad(w8, ((0, 0), (0, OUT_PAD - NUM_CLASSES)))  # [64, 128]

    logit_mask = jnp.where(jnp.arange(OUT_PAD) < NUM_CLASSES, 0.0, -1e30)
    logit_mask = logit_mask.astype(jnp.float32).reshape(1, OUT_PAD)

    return {
        "w5": lin_t(k5, 256, in_feats),
        "w6": lin_t(k6, 128, 256),
        "w7": lin_t(k7, 64, 128),
        "w8": w8,
        "logit_mask": logit_mask,
    }
    # NOTE: l5-l8 use bias=False in the PyTorch module, so there are no biases.
    # TODO(synk): l1-l4 conv weights, dropout and maxpool are defined in the
    # module but never used by forward(), so they are omitted.


if __name__ == "__main__":
    key = jax.random.PRNGKey(0)
    kx, kp = jax.random.split(key)

    # Small NCHW input: [batch=2, channels=4, H=16, W=16] -> 1024 flat features.
    x = jax.random.normal(kx, (2, 4, 16, 16), dtype=jnp.float32)
    params = init_params(kp, in_feats=4 * 16 * 16)

    out = cnn_forward(x, params)
    jax.block_until_ready(out)

    # Reference in plain JAX with the same bf16-compute / f32-accumulate recipe.
    xf = x.reshape(2, -1).astype(jnp.bfloat16)
    h = jnp.maximum(jnp.dot(xf, params["w5"],
                            preferred_element_type=jnp.float32), 0.0)
    h = jnp.maximum(jnp.dot(h.astype(jnp.bfloat16), params["w6"],
                            preferred_element_type=jnp.float32), 0.0)
    h = jnp.maximum(jnp.dot(h.astype(jnp.bfloat16), params["w7"],
                            preferred_element_type=jnp.float32), 0.0)
    logits = jnp.dot(h.astype(jnp.bfloat16), params["w8"][:, :NUM_CLASSES],
                     preferred_element_type=jnp.float32)
    ref = jax.nn.softmax(logits, axis=-1)

    assert out.shape == (2, NUM_CLASSES)
    assert jnp.allclose(out, ref, atol=2e-2, rtol=2e-2)
    assert jnp.allclose(jnp.sum(out, axis=-1), 1.0, atol=1e-2)

    print("KERNEL_OK")
</pallas_src>

<mosaic_0001>
module attributes {stable_mosaic.version = 11 : i64} {
  func.func @_mlp_softmax_kernel(%arg0: i32, %arg1: memref<16x1024xf32, #tpu.memory_space<vmem>>, %arg2: memref<1024x256xbf16, #tpu.memory_space<vmem>>, %arg3: memref<256x128xbf16, #tpu.memory_space<vmem>>, %arg4: memref<128x64xbf16, #tpu.memory_space<vmem>>, %arg5: memref<64x128xbf16, #tpu.memory_space<vmem>>, %arg6: memref<1x128xf32, #tpu.memory_space<vmem>>, %arg7: memref<16x128xbf16, #tpu.memory_space<vmem>>) attributes {dimension_semantics = [#tpu.dimension_semantics<parallel>], iteration_bounds = array<i64: 1>, scalar_prefetch = 0 : i64, scratch_operands = 0 : i64, tpu.core_type = #tpu.core_type<tc>, window_params = [{transform_indices = @transform_0, window_bounds = array<i64: 16, 1024>}, {pipeline_mode = #tpu.pipeline_mode<synchronous>, transform_indices = @transform_1, window_bounds = array<i64: 1024, 256>}, {pipeline_mode = #tpu.pipeline_mode<synchronous>, transform_indices = @transform_2, window_bounds = array<i64: 256, 128>}, {pipeline_mode = #tpu.pipeline_mode<synchronous>, transform_indices = @transform_3, window_bounds = array<i64: 128, 64>}, {pipeline_mode = #tpu.pipeline_mode<synchronous>, transform_indices = @transform_4, window_bounds = array<i64: 64, 128>}, {pipeline_mode = #tpu.pipeline_mode<synchronous>, transform_indices = @transform_5, window_bounds = array<i64: 1, 128>}, {transform_indices = @transform_6, window_bounds = array<i64: 16, 128>}]} {
    %c0 = arith.constant 0 : index
    %c0_0 = arith.constant 0 : index
    %0 = vector.load %arg1[%c0, %c0_0] : memref<16x1024xf32, #tpu.memory_space<vmem>>, vector<16x1024xf32>
    %1 = arith.truncf %0 : vector<16x1024xf32> to vector<16x1024xbf16>
    %c0_1 = arith.constant 0 : index
    %c0_2 = arith.constant 0 : index
    %2 = vector.load %arg2[%c0_1, %c0_2] : memref<1024x256xbf16, #tpu.memory_space<vmem>>, vector<1024x256xbf16>
    %cst = arith.constant dense<0.000000e+00> : vector<16x256xf32>
    %3 = tpu.matmul %1, %2, %cst {dimension_numbers = #tpu.dot_dimension_numbers<[1], [0], [0], [1], [0, 0, 1, 1], [], []>} : vector<16x1024xbf16>, vector<1024x256xbf16>, vector<16x256xf32> -> vector<16x256xf32>
    %cst_3 = arith.constant 0.000000e+00 : f32
    %4 = vector.broadcast %cst_3 : f32 to vector<16x256xf32>
    %5 = arith.maximumf %3, %4 : vector<16x256xf32>
    %6 = arith.truncf %5 : vector<16x256xf32> to vector<16x256xbf16>
    %c0_4 = arith.constant 0 : index
    %c0_5 = arith.constant 0 : index
    %7 = vector.load %arg3[%c0_4, %c0_5] : memref<256x128xbf16, #tpu.memory_space<vmem>>, vector<256x128xbf16>
    %cst_6 = arith.constant dense<0.000000e+00> : vector<16x128xf32>
    %8 = tpu.matmul %6, %7, %cst_6 {dimension_numbers = #tpu.dot_dimension_numbers<[1], [0], [0], [1], [0, 0, 1, 1], [], []>} : vector<16x256xbf16>, vector<256x128xbf16>, vector<16x128xf32> -> vector<16x128xf32>
    %cst_7 = arith.constant 0.000000e+00 : f32
    %9 = vector.broadcast %cst_7 : f32 to vector<16x128xf32>
    %10 = arith.maximumf %8, %9 : vector<16x128xf32>
    %11 = arith.truncf %10 : vector<16x128xf32> to vector<16x128xbf16>
    %c0_8 = arith.constant 0 : index
    %c0_9 = arith.constant 0 : index
    %12 = vector.load %arg4[%c0_8, %c0_9] : memref<128x64xbf16, #tpu.memory_space<vmem>>, vector<128x64xbf16>
    %cst_10 = arith.constant dense<0.000000e+00> : vector<16x64xf32>
    %13 = tpu.matmul %11, %12, %cst_10 {dimension_numbers = #tpu.dot_dimension_numbers<[1], [0], [0], [1], [0, 0, 1, 1], [], []>} : vector<16x128xbf16>, vector<128x64xbf16>, vector<16x64xf32> -> vector<16x64xf32>
    %cst_11 = arith.constant 0.000000e+00 : f32
    %14 = vector.broadcast %cst_11 : f32 to vector<16x64xf32>
    %15 = arith.maximumf %13, %14 : vector<16x64xf32>
    %16 = arith.truncf %15 : vector<16x64xf32> to vector<16x64xbf16>
    %c0_12 = arith.constant 0 : index
    %c0_13 = arith.constant 0 : index
    %17 = vector.load %arg5[%c0_12, %c0_13] : memref<64x128xbf16, #tpu.memory_space<vmem>>, vector<64x128xbf16>
    %cst_14 = arith.constant dense<0.000000e+00> : vector<16x128xf32>
    %18 = tpu.matmul %16, %17, %cst_14 {dimension_numbers = #tpu.dot_dimension_numbers<[1], [0], [0], [1], [0, 0, 1, 1], [], []>} : vector<16x64xbf16>, vector<64x128xbf16>, vector<16x128xf32> -> vector<16x128xf32>
    %c0_15 = arith.constant 0 : index
    %c0_16 = arith.constant 0 : index
    %19 = vector.load %arg6[%c0_15, %c0_16] : memref<1x128xf32, #tpu.memory_space<vmem>>, vector<1x128xf32>
    %20 = vector.broadcast %19 : vector<1x128xf32> to vector<16x128xf32>
    %21 = arith.addf %18, %20 : vector<16x128xf32>
    %cst_17 = arith.constant dense<0xFF800000> : vector<16xf32>
    %22 = vector.multi_reduction <maximumf>, %21, %cst_17 [1] : vector<16x128xf32> to vector<16xf32>
    %23 = vector.shape_cast %22 : vector<16xf32> to vector<16x1xf32>
    %24 = vector.broadcast %23 : vector<16x1xf32> to vector<16x128xf32>
    %25 = arith.subf %21, %24 : vector<16x128xf32>
    %26 = math.exp %25 : vector<16x128xf32>
    %cst_18 = arith.constant dense<0.000000e+00> : vector<16xf32>
    %27 = vector.multi_reduction <add>, %26, %cst_18 [1] : vector<16x128xf32> to vector<16xf32>
    %28 = vector.shape_cast %27 : vector<16xf32> to vector<16x1xf32>
    %29 = vector.broadcast %28 : vector<16x1xf32> to vector<16x128xf32>
    %30 = arith.divf %26, %29 : vector<16x128xf32>
    %31 = arith.truncf %30 : vector<16x128xf32> to vector<16x128xbf16>
    %c0_19 = arith.constant 0 : index
    %c0_20 = arith.constant 0 : index
    %32 = vector.load %arg7[%c0_19, %c0_20] : memref<16x128xbf16, #tpu.memory_space<vmem>>, vector<16x128xbf16>
    tpu.vector_store %arg7[%c0_19, %c0_20], %31 {strides = array<i32>} : memref<16x128xbf16, #tpu.memory_space<vmem>>, vector<16x128xbf16>,
    return
  }
  func.func @transform_0(%arg0: i32) -> (i32, i32) {
    %c0_i32 = arith.constant 0 : i32
    %c0_i32_0 = arith.constant 0 : i32
    return %arg0, %c0_i32 : i32, i32
  }
  func.func @transform_1(%arg0: i32) -> (i32, i32) {
    %c0_i32 = arith.constant 0 : i32
    %c0_i32_0 = arith.constant 0 : i32
    %c0_i32_1 = arith.constant 0 : i32
    return %c0_i32, %c0_i32_0 : i32, i32
  }
  func.func @transform_2(%arg0: i32) -> (i32, i32) {
    %c0_i32 = arith.constant 0 : i32
    %c0_i32_0 = arith.constant 0 : i32
    %c0_i32_1 = arith.constant 0 : i32
    return %c0_i32, %c0_i32_0 : i32, i32
  }
  func.func @transform_3(%arg0: i32) -> (i32, i32) {
    %c0_i32 = arith.constant 0 : i32
    %c0_i32_0 = arith.constant 0 : i32
    %c0_i32_1 = arith.constant 0 : i32
    return %c0_i32, %c0_i32_0 : i32, i32
  }
  func.func @transform_4(%arg0: i32) -> (i32, i32) {
    %c0_i32 = arith.constant 0 : i32
    %c0_i32_0 = arith.constant 0 : i32
    %c0_i32_1 = arith.constant 0 : i32
    return %c0_i32, %c0_i32_0 : i32, i32
  }
  func.func @transform_5(%arg0: i32) -> (i32, i32) {
    %c0_i32 = arith.constant 0 : i32
    %c0_i32_0 = arith.constant 0 : i32
    %c0_i32_1 = arith.constant 0 : i32
    return %c0_i32, %c0_i32_0 : i32, i32
  }
  func.func @transform_6(%arg0: i32) -> (i32, i32) {
    %c0_i32 = arith.constant 0 : i32
    %c0_i32_0 = arith.constant 0 : i32
    return %arg0, %c0_i32 : i32, i32
  }
}

</mosaic_0001>

<bundles_post_ra>
// kernel: tpu_custom_call.1
= control target key start
LH: loop header
LB: loop body
LE: loop exit
PB: predicated region body
PF: predicated region fallthrough
CT: control target
= control target key end

     0   :  { %11 = vsyncpa [#allocation3], 0  ;;  %s2180_s0 = inlined_call_operand.hbm [shape: f32[16,1024], index: 0, kind: input, shape index: {}]   ;;  %s2181_s1 = inlined_call_operand.hbm [shape: bf16[1024,256], index: 1, kind: input, shape index: {}]   ;;  %s2182_s2 = inlined_call_operand.hbm [shape: bf16[256,128], index: 2, kind: input, shape index: {}]   ;;  %s2183_s3 = inlined_call_operand.vmem [shape: bf16[128,64], index: 3, kind: input, shape index: {}]   ;;  %s2184_s4 = inlined_call_operand.vmem [shape: bf16[64,128], index: 4, kind: input, shape index: {}]   ;;  %s2185_s5 = inlined_call_operand.vmem [shape: f32[1,128], index: 5, kind: input, shape index: {}]   ;;  %s2186_s6 = inlined_call_operand.hbm [shape: bf16[16,128], index: 6, kind: output, shape index: {}]  }
   0x1   :  { %12 = vsyncpa [#allocation6], 0 }
   0x2   :  { %13 = vsyncpa [#allocation4], 0  ;;  %s2026_s21 = smov [#allocation5]   ;;  %s1932_s25 = scalar_lea.hbm %s2181_s1, 16384 }
   0x3   :  { %s31_s22 = sshll.u32 %s2026_s21, 4  ;;  %p1933_p0 = scmp.ne.s32.totalorder %s2181_s1, %s1932_s25  ;;  %s32_s22 = int_to_ptr.vmem [resolvable:$true] %s31_s22 }
   0x4   :  { %p1936_p1 = scmp.lt.u32.totalorder %s1932_s25, %s2181_s1 }
   0x6   :  { %p1938_p2 = pnand %p1936_p1, %p1933_p0 }
   0x8   :  { %1941 = shalt.err (!%p1938_p2)
}
   0x9   :  { %s1942_s30 = scalar_lea.vmem %s32_s22, 16384  ;;  %p1947_p4 = scmp.lt.s32.totalorder %s32_s22, %s32_s22 }
   0xa   :  { %p1943_p3 = scmp.ne.s32.totalorder %s32_s22, %s1942_s30  ;;  %p1948_p5 = scmp.lt.s32.totalorder %s1942_s30, %s1942_s30 }
   0xc   :  { %p1949_p6 = por %p1948_p5, %p1947_p4 }
   0xe   :  { %p1950_p7 = pnand %p1949_p6, %p1943_p3 }
  0x10   :  { %1953 = shalt.err (!%p1950_p7)
}
  0x11   :  { %s2027_s7 = smov 128   ;;  %s2028_s8 = smov 8  }
  0x12   :  { %37 = dma.hbm_to_vmem [thread:$0]  %s2181_s1, 16384, %s32_s22, [#allocation6], %s2027_s7, %s2027_s7, %s2028_s8  }
  0x13   :  { %s2029_s11 = smov [#allocation2]   ;;  %s1954_s15 = scalar_lea.hbm %s2180_s0, 2048 }
  0x14   :  { %s19_s12 = sshll.u32 %s2029_s11, 4  ;;  %p1955_p8 = scmp.ne.s32.totalorder %s2180_s0, %s1954_s15  ;;  %s20_s12 = int_to_ptr.vmem [resolvable:$true] %s19_s12 }
  0x15   :  { %p1958_p9 = scmp.lt.u32.totalorder %s1954_s15, %s2180_s0 }
  0x17   :  { %p1960_p10 = pnand %p1958_p9, %p1955_p8 }
  0x19   :  { %1963 = shalt.err (!%p1960_p10)
}
  0x1a   :  { %s1964_s20 = scalar_lea.vmem %s20_s12, 2048  ;;  %p1969_p12 = scmp.lt.s32.totalorder %s20_s12, %s20_s12 }
  0x1b   :  { %p1965_p11 = scmp.ne.s32.totalorder %s20_s12, %s1964_s20  ;;  %p1970_p13 = scmp.lt.s32.totalorder %s1964_s20, %s1964_s20 }
  0x1d   :  { %p1971_p0 = por %p1970_p13, %p1969_p12 }
  0x1f   :  { %p1972_p1 = pnand %p1971_p0, %p1965_p11 }
  0x21   :  { %1975 = shalt.err (!%p1972_p1)
}
  0x22   :  { %s2030_s1 = smov 1024   ;;  %s2031_s21 = smov 64  }
  0x23   :  { %25 = dma.hbm_to_vmem [thread:$0]  %s2180_s0, 2048, %s20_s12, [#allocation3], %s2030_s1, %s2030_s1, %s2031_s21  }
  0x24   :  { %s2032_s24 = smov [#allocation7]   ;;  %s1976_s28 = scalar_lea.hbm %s2182_s2, 2048 }
  0x25   :  { %s43_s25 = sshll.u32 %s2032_s24, 4  ;;  %p1977_p2 = scmp.ne.s32.totalorder %s2182_s2, %s1976_s28  ;;  %s44_s25 = int_to_ptr.vmem [resolvable:$true] %s43_s25 }
  0x26   :  { %p1980_p3 = scmp.lt.u32.totalorder %s1976_s28, %s2182_s2 }
  0x28   :  { %p1982_p4 = pnand %p1980_p3, %p1977_p2 }
  0x2a   :  { %1985 = shalt.err (!%p1982_p4)
}
  0x2b   :  { %s1986_s9 = scalar_lea.vmem %s44_s25, 2048  ;;  %p1991_p6 = scmp.lt.s32.totalorder %s44_s25, %s44_s25 }
  0x2c   :  { %p1987_p5 = scmp.ne.s32.totalorder %s44_s25, %s1986_s9  ;;  %p1992_p7 = scmp.lt.s32.totalorder %s1986_s9, %s1986_s9 }
  0x2e   :  { %p1993_p8 = por %p1992_p7, %p1991_p6 }
  0x30   :  { %p1994_p9 = pnand %p1993_p8, %p1987_p5 }
  0x32   :  { %1997 = shalt.err (!%p1994_p9)
}
  0x33   :  { %s2033_s0 = smov 4  }
  0x34   :  { %49 = dma.hbm_to_vmem [thread:$0]  %s2182_s2, 2048, %s44_s25, [#allocation6], %s2031_s21, %s2031_s21, %s2033_s0  }
  0x35   :  { %2020 = dma.done.wait [#allocation3], 2048  }
  0x36   :  { %2021 = vsyncadd [#allocation3], 4294965248 }
  0x37   :  { %2022 = dma.done.wait [#allocation6], 18432  }
  0x38   :  { %2023 = vsyncadd [#allocation6], 4294948864  ;;  %v1704_v0 = vld [vmem:[#allocation5 + $0x104] ss:$8 sps:$4 sm:$0xff]   ;;  %v1706_v1 = vld [vmem:[#allocation5 + $0x100] ss:$8 sps:$4 sm:$0xff]  }
  0x39   :  { %901 = vmatprep.subr.bf16.mxu0 %v1704_v0  ;;  %v1707_v2 = vld [vmem:[#allocation5 + $0x114] ss:$8 sps:$4 sm:$0xff]   ;;  %v1709_v3 = vld [vmem:[#allocation5 + $0x110] ss:$8 sps:$4 sm:$0xff]   ;;  %v1710_v4 = vld [vmem:[#allocation5 + $0x124] ss:$8 sps:$4 sm:$0xff]  }
  0x3a   :  { %902 = vmatpush1.bf16.msra.mxu0 %v1706_v1  ;;  %v1712_v5 = vld [vmem:[#allocation5 + $0x120] ss:$8 sps:$4 sm:$0xff]   ;;  %v1713_v6 = vld [vmem:[#allocation5 + $0x134] ss:$8 sps:$4 sm:$0xff]   ;;  %v1715_v7 = vld [vmem:[#allocation5 + $0x130] ss:$8 sps:$4 sm:$0xff]  }
  0x3b   :  { %903 = vmatprep.subr.bf16.mxu0 %v1707_v2  ;;  %v1716_v8 = vld [vmem:[#allocation5 + $0x144] ss:$8 sps:$4 sm:$0xff]   ;;  %v1718_v9 = vld [vmem:[#allocation5 + $0x140] ss:$8 sps:$4 sm:$0xff]   ;;  %v1719_v10 = vld [vmem:[#allocation5 + $0x154] ss:$8 sps:$4 sm:$0xff]  }
  0x3c   :  { %v1721_v11 = vld [vmem:[#allocation5 + $0x150] ss:$8 sps:$4 sm:$0xff]   ;;  %v1722_v12 = vld [vmem:[#allocation5 + $0x164] ss:$8 sps:$4 sm:$0xff]   ;;  %v1724_v16 = vld [vmem:[#allocation5 + $0x160] ss:$8 sps:$4 sm:$0xff]  }
  0x3d   :  { %v69_v13 = vld [vmem:[#allocation2 + $0x18] sm:$0xff]  ;;  %v1728_v19 = vld [vmem:[#allocation5 + $0x184] ss:$8 sps:$4 sm:$0xff]   ;;  %v1730_v20 = vld [vmem:[#allocation5 + $0x180] ss:$8 sps:$4 sm:$0xff]   ;;  %vm2035_vm0 = vmmov 0  }
  0x3e   :  { %904 = vmatpush1.bf16.msra.mxu0 %v1709_v3  ;;  %v77_v14 = vld [vmem:[#allocation2 + $0x58] sm:$0xff]  ;;  %v1734_v23 = vld [vmem:[#allocation5 + $0x1a4] ss:$8 sps:$4 sm:$0xff]   ;;  %v1736_v24 = vld [vmem:[#allocation5 + $0x1a0] ss:$8 sps:$4 sm:$0xff]   ;;  %vm1355_vm1 = vcmask 523264  }
  0x3f   :  { %905 = vmatprep.subr.bf16.mxu0 %v1710_v4  ;;  %v85_v15 = vpack.c.bf16 %v77_v14, %v69_v13  ;;  %v1725_v17 = vld [vmem:[#allocation5 + $0x174] ss:$8 sps:$4 sm:$0xff]   ;;  %v1727_v18 = vld [vmem:[#allocation5 + $0x170] ss:$8 sps:$4 sm:$0xff]   ;;  %v1740_v27 = vld [vmem:[#allocation5 + $0x1c4] ss:$8 sps:$4 sm:$0xff]  }
  0x40   :  { %v1731_v21 = vld [vmem:[#allocation5 + $0x194] ss:$8 sps:$4 sm:$0xff]   ;;  %v1733_v22 = vld [vmem:[#allocation5 + $0x190] ss:$8 sps:$4 sm:$0xff]   ;;  %v1800_v28 = vld [vmem:[#allocation5 + $0x4] ss:$8 sps:$4 sm:$0xff]  }
  0x41   :  { %933 = vmatprep.mubr.bf16.mxu0 %v85_v15  ;;  %v1737_v25 = vld [vmem:[#allocation5 + $0x1b4] ss:$8 sps:$4 sm:$0xff]   ;;  %v1739_v26 = vld [vmem:[#allocation5 + $0x1b0] ss:$8 sps:$4 sm:$0xff]   ;;  %v1802_v29 = vld [vmem:[#allocation5] ss:$8 sps:$4 sm:$0xff]   ;;  %858 = vmatprep.subr.bf16.mxu1 %v1800_v28 }
  0x42   :  { %906 = vmatpush1.bf16.msra.mxu0 %v1712_v5  ;;  %v1742_v30 = vld [vmem:[#allocation5 + $0x1c0] ss:$8 sps:$4 sm:$0xff]   ;;  %859 = vmatpush1.bf16.msra.mxu1 %v1802_v29  ;;  %v1743_v31 = vld [vmem:[#allocation5 + $0x1d4] ss:$8 sps:$4 sm:$0xff]   ;;  %v1808_v33 = vld [vmem:[#allocation5 + $0x10] ss:$8 sps:$4 sm:$0xff]  }
  0x43   :  { %907 = vmatprep.subr.bf16.mxu0 %v1713_v6  ;;  %v1806_v32 = vld [vmem:[#allocation5 + $0x14] ss:$8 sps:$4 sm:$0xff]   ;;  %v1745_v34 = vld [vmem:[#allocation5 + $0x1d0] ss:$8 sps:$4 sm:$0xff]   ;;  %v1812_v35 = vld [vmem:[#allocation5 + $0x24] ss:$8 sps:$4 sm:$0xff]  }
  0x44   :  { %860 = vmatprep.subr.bf16.mxu1 %v1806_v32  ;;  %v1814_v36 = vld [vmem:[#allocation5 + $0x20] ss:$8 sps:$4 sm:$0xff]   ;;  %v1746_v37 = vld [vmem:[#allocation5 + $0x1e4] ss:$8 sps:$4 sm:$0xff]   ;;  %v1818_v39 = vld [vmem:[#allocation5 + $0x34] ss:$8 sps:$4 sm:$0xff]  }
  0x45   :  { %v1748_v38 = vld [vmem:[#allocation5 + $0x1e0] ss:$8 sps:$4 sm:$0xff]   ;;  %v1749_v40 = vld [vmem:[#allocation5 + $0x1f4] ss:$8 sps:$4 sm:$0xff]   ;;  %v1820_v41 = vld [vmem:[#allocation5 + $0x30] ss:$8 sps:$4 sm:$0xff]  }
  0x46   :  { %908 = vmatpush1.bf16.msra.mxu0 %v1715_v7  ;;  %861 = vmatpush1.bf16.msra.mxu1 %v1808_v33  ;;  %v1824_v42 = vld [vmem:[#allocation5 + $0x44] ss:$8 sps:$4 sm:$0xff]   ;;  %v1751_v43 = vld [vmem:[#allocation5 + $0x1f0] ss:$8 sps:$4 sm:$0xff]   ;;  %v1826_v49 = vld [vmem:[#allocation5 + $0x40] ss:$8 sps:$4 sm:$0xff]  }
  0x47   :  { %909 = vmatprep.subr.bf16.mxu0 %v1716_v8  ;;  %862 = vmatprep.subr.bf16.mxu1 %v1812_v35  ;;  %v68_v44 = vld [vmem:[#allocation2 + $0x10] sm:$0xff]  ;;  %v1754_v45 = vld [vmem:[#allocation5 + $0x204] ss:$8 sps:$4 sm:$0xff]   ;;  %v1752_v52 = vld [vmem:[#allocation5 + $0x200] ss:$8 sps:$4 sm:$0xff]  }
  0x48   :  { %v76_v46 = vld [vmem:[#allocation2 + $0x50] sm:$0xff]  ;;  %v71_v47 = vld [vmem:[#allocation2 + $0x28] sm:$0xff]  ;;  %v66_v35 = vld [vmem:[#allocation2] sm:$0xff] }
  0x49   :  { %v79_v48 = vld [vmem:[#allocation2 + $0x68] sm:$0xff]  ;;  %v1830_v50 = vld [vmem:[#allocation5 + $0x54] ss:$8 sps:$4 sm:$0xff]   ;;  %v84_v51 = vpack.c.bf16 %v76_v46, %v68_v44  ;;  %v1832_v55 = vld [vmem:[#allocation5 + $0x50] ss:$8 sps:$4 sm:$0xff]  }
  0x4a   :  { %910 = vmatpush1.bf16.msra.mxu0 %v1718_v9  ;;  %863 = vmatpush1.bf16.msra.mxu1 %v1814_v36  ;;  %v1757_v53 = vld [vmem:[#allocation5 + $0x214] ss:$8 sps:$4 sm:$0xff]   ;;  %v87_v54 = vpack.c.bf16 %v79_v48, %v71_v47  ;;  %v1836_v56 = vld [vmem:[#allocation5 + $0x64] ss:$8 sps:$4 sm:$0xff]   ;;  %v1755_v57 = vld [vmem:[#allocation5 + $0x210] ss:$8 sps:$4 sm:$0xff]  }
  0x4b   :  { %911 = vmatprep.subr.bf16.mxu0 %v1719_v10  ;;  %864 = vmatprep.subr.bf16.mxu1 %v1818_v39  ;;  %v1760_v58 = vld [vmem:[#allocation5 + $0x224] ss:$8 sps:$4 sm:$0xff]   ;;  %v1838_v59 = vld [vmem:[#allocation5 + $0x60] ss:$8 sps:$4 sm:$0xff]   ;;  %v1842_v60 = vld [vmem:[#allocation5 + $0x74] ss:$8 sps:$4 sm:$0xff]  }
  0x4c   :  { %v1758_v61 = vld [vmem:[#allocation5 + $0x220] ss:$8 sps:$4 sm:$0xff]   ;;  %v1763_v62 = vld [vmem:[#allocation5 + $0x234] ss:$8 sps:$4 sm:$0xff]   ;;  %v1844_v63 = vld [vmem:[#allocation5 + $0x70] ss:$8 sps:$4 sm:$0xff]  }
  0x4d   :  { %v1848_v0 = vld [vmem:[#allocation5 + $0x84] ss:$8 sps:$4 sm:$0xff]   ;;  %v1761_v1 = vld [vmem:[#allocation5 + $0x230] ss:$8 sps:$4 sm:$0xff]   ;;  %v1850_v3 = vld [vmem:[#allocation5 + $0x80] ss:$8 sps:$4 sm:$0xff]  }
  0x4e   :  { %912 = vmatpush1.bf16.msra.mxu0 %v1721_v11  ;;  %865 = vmatpush1.bf16.msra.mxu1 %v1820_v41  ;;  %v1766_v2 = vld [vmem:[#allocation5 + $0x244] ss:$8 sps:$4 sm:$0xff]   ;;  %v1854_v4 = vld [vmem:[#allocation5 + $0x94] ss:$8 sps:$4 sm:$0xff]   ;;  %v1764_v5 = vld [vmem:[#allocation5 + $0x240] ss:$8 sps:$4 sm:$0xff]  }
  0x4f   :  { %913 = vmatprep.subr.bf16.mxu0 %v1722_v12  ;;  %866 = vmatprep.subr.bf16.mxu1 %v1824_v42  ;;  %v1769_v6 = vld [vmem:[#allocation5 + $0x254] ss:$8 sps:$4 sm:$0xff]   ;;  %v1856_v7 = vld [vmem:[#allocation5 + $0x90] ss:$8 sps:$4 sm:$0xff]   ;;  %v1860_v8 = vld [vmem:[#allocation5 + $0xa4] ss:$8 sps:$4 sm:$0xff]  }
  0x50   :  { %v1767_v9 = vld [vmem:[#allocation5 + $0x250] ss:$8 sps:$4 sm:$0xff]   ;;  %v1772_v10 = vld [vmem:[#allocation5 + $0x264] ss:$8 sps:$4 sm:$0xff]   ;;  %v1862_v11 = vld [vmem:[#allocation5 + $0xa0] ss:$8 sps:$4 sm:$0xff]  }
  0x51   :  { %v1866_v12 = vld [vmem:[#allocation5 + $0xb4] ss:$8 sps:$4 sm:$0xff]   ;;  %v1770_v13 = vld [vmem:[#allocation5 + $0x260] ss:$8 sps:$4 sm:$0xff]   ;;  %v1884_v28 = vld [vmem:[#allocation5 + $0xe4] ss:$8 sps:$4 sm:$0xff]  }
  0x52   :  { %914 = vmatpush1.bf16.msra.mxu0 %v1724_v16  ;;  %867 = vmatpush1.bf16.msra.mxu1 %v1826_v49  ;;  %v67_v14 = vld [vmem:[#allocation2 + $0x8] sm:$0xff]  ;;  %v1775_v16 = vld [vmem:[#allocation5 + $0x274] ss:$8 sps:$4 sm:$0xff]   ;;  %v74_v36 = vld [vmem:[#allocation2 + $0x40] sm:$0xff] }
  0x53   :  { %915 = vmatprep.subr.bf16.mxu0 %v1725_v17  ;;  %868 = vmatprep.subr.bf16.mxu1 %v1830_v50  ;;  %v75_v15 = vld [vmem:[#allocation2 + $0x48] sm:$0xff]  ;;  %v1868_v17 = vld [vmem:[#allocation5 + $0xb0] ss:$8 sps:$4 sm:$0xff]   ;;  %v1787_v33 = vld [vmem:[#allocation5 + $0x2b4] ss:$8 sps:$4 sm:$0xff]   ;;  %v82_v41 = vpack.c.bf16 %v74_v36, %v66_v35 }
  0x54   :  { %v1784_v29 = vld [vmem:[#allocation5 + $0x2a4] ss:$8 sps:$4 sm:$0xff]   ;;  %v1782_v32 = vld [vmem:[#allocation5 + $0x2a0] ss:$8 sps:$4 sm:$0xff]   ;;  %v1793_v44 = vld [vmem:[#allocation5 + $0x2d4] ss:$8 sps:$4 sm:$0xff]  }
  0x55   :  { %v1790_v39 = vld [vmem:[#allocation5 + $0x2c4] ss:$8 sps:$4 sm:$0xff]   ;;  %v1900_v46 = vld [vmem:[#allocation7 + $0x50] sm:$0xff]   ;;  %v1902_v50 = vld [vmem:[#allocation7 + $0x58] sm:$0xff]  }
  0x56   :  { %916 = vmatpush1.bf16.msra.mxu0 %v1727_v18  ;;  %869 = vmatpush1.bf16.msra.mxu1 %v1832_v55  ;;  %v83_v18 = vpack.c.bf16 %v75_v15, %v67_v14  ;;  %v1898_v42 = vld [vmem:[#allocation7 + $0x48] sm:$0xff]   ;;  %v1791_v47 = vld [vmem:[#allocation5 + $0x2d0] ss:$8 sps:$4 sm:$0xff]  }
  0x57   :  { %917 = vmatprep.subr.bf16.mxu0 %v1728_v19  ;;  %870 = vmatprep.subr.bf16.mxu1 %v1836_v56  ;;  %v1872_v19 = vld [vmem:[#allocation5 + $0xc4] ss:$8 sps:$4 sm:$0xff]   ;;  %v1901_v49 = vld [vmem:[#allocation7 + $0x10] sm:$0xff]  }
  0x58   :  { %890 = vmatprep.mubr.bf16.mxu1 %v83_v18  ;;  %v1796_v48 = vld [vmem:[#allocation5 + $0x2e4] ss:$8 sps:$4 sm:$0xff]   ;;  %v1797_v55 = vld [vmem:[#allocation5 + $0x2f0] ss:$8 sps:$4 sm:$0xff]  }
  0x59   :  { %v1805_v56 = vld [vmem:[#allocation5 + $0x304] ss:$8 sps:$4 sm:$0xff]   ;;  %v1845_v14 = vld [vmem:[#allocation5 + $0x370] ss:$8 sps:$4 sm:$0xff]  }
  0x5a   :  { %918 = vmatpush1.bf16.msra.mxu0 %v1730_v20  ;;  %871 = vmatpush1.bf16.msra.mxu1 %v1838_v59  ;;  %v1773_v20 = vld [vmem:[#allocation5 + $0x270] ss:$8 sps:$4 sm:$0xff]   ;;  %v1853_v15 = vld [vmem:[#allocation5 + $0x384] ss:$8 sps:$4 sm:$0xff]  }
  0x5b   :  { %919 = vmatprep.subr.bf16.mxu0 %v1731_v21  ;;  %872 = vmatprep.subr.bf16.mxu1 %v1842_v60  ;;  %v1778_v21 = vld [vmem:[#allocation5 + $0x284] ss:$8 sps:$4 sm:$0xff]   ;;  %v73_v59 = vld [vmem:[#allocation2 + $0x38] sm:$0xff]  ;;  %v1908_v36 = vld [vmem:[#allocation7 + $0x70] sm:$0xff]  }
  0x5c   :  { %v81_v60 = vld [vmem:[#allocation2 + $0x78] sm:$0xff]  ;;  %v1907_v35 = vld [vmem:[#allocation7 + $0x28] sm:$0xff]  }
  0x5d   :  { %v1857_v18 = vld [vmem:[#allocation5 + $0x390] ss:$8 sps:$4 sm:$0xff]  }
  0x5e   :  { %920 = vmatpush1.bf16.msra.mxu0 %v1733_v22  ;;  %873 = vmatpush1.bf16.msra.mxu1 %v1844_v63  ;;  %v1874_v22 = vld [vmem:[#allocation5 + $0xc0] ss:$8 sps:$4 sm:$0xff]  }
  0x5f   :  { %921 = vmatprep.subr.bf16.mxu0 %v1734_v23  ;;  %874 = vmatprep.subr.bf16.mxu1 %v1848_v0  ;;  %v1878_v23 = vld [vmem:[#allocation5 + $0xd4] ss:$8 sps:$4 sm:$0xff]   ;;  %v1803_v63 = vld [vmem:[#allocation5 + $0x300] ss:$8 sps:$4 sm:$0xff]   ;;  %v89_v0 = vpack.c.bf16 %v81_v60, %v73_v59 }
  0x60   :  { %v1912_v59 = vld [vmem:[%s2183_s3] sm:$0xff]   ;;  %v1913_v60 = vld [vmem:[%s2183_s3 + $0x8] sm:$0xff]  }
  0x62   :  { %922 = vmatpush1.bf16.msra.mxu0 %v1736_v24  ;;  %875 = vmatpush1.bf16.msra.mxu1 %v1850_v3  ;;  %v1776_v24 = vld [vmem:[#allocation5 + $0x280] ss:$8 sps:$4 sm:$0xff]   ;;  %v1817_v3 = vld [vmem:[#allocation5 + $0x324] ss:$8 sps:$4 sm:$0xff]  }
  0x63   :  { %923 = vmatprep.subr.bf16.mxu0 %v1737_v25  ;;  %876 = vmatprep.subr.bf16.mxu1 %v1854_v4  ;;  %v1781_v25 = vld [vmem:[#allocation5 + $0x294] ss:$8 sps:$4 sm:$0xff]   ;;  %v1815_v4 = vld [vmem:[#allocation5 + $0x320] ss:$8 sps:$4 sm:$0xff]  }
  0x66   :  { %924 = vmatpush1.bf16.msra.mxu0 %v1739_v26  ;;  %877 = vmatpush1.bf16.msra.mxu1 %v1856_v7  ;;  %v1880_v26 = vld [vmem:[#allocation5 + $0xd0] ss:$8 sps:$4 sm:$0xff]   ;;  %v1829_v7 = vld [vmem:[#allocation5 + $0x344] ss:$8 sps:$4 sm:$0xff]  }
  0x67   :  { %925 = vmatprep.subr.bf16.mxu0 %v1740_v27  ;;  %878 = vmatprep.subr.bf16.mxu1 %v1860_v8  ;;  %v1779_v27 = vld [vmem:[#allocation5 + $0x290] ss:$8 sps:$4 sm:$0xff]   ;;  %v1827_v8 = vld [vmem:[#allocation5 + $0x340] ss:$8 sps:$4 sm:$0xff]  }
  0x6a   :  { %926 = vmatpush1.bf16.msra.mxu0 %v1742_v30  ;;  %879 = vmatpush1.bf16.msra.mxu1 %v1862_v11  ;;  %v1886_v30 = vld [vmem:[#allocation5 + $0xe0] ss:$8 sps:$4 sm:$0xff]   ;;  %v1841_v11 = vld [vmem:[#allocation5 + $0x364] ss:$8 sps:$4 sm:$0xff]  }
  0x6b   :  { %927 = vmatprep.subr.bf16.mxu0 %v1743_v31  ;;  %880 = vmatprep.subr.bf16.mxu1 %v1866_v12  ;;  %v1890_v31 = vld [vmem:[#allocation5 + $0xf4] ss:$8 sps:$4 sm:$0xff]   ;;  %v1839_v12 = vld [vmem:[#allocation5 + $0x360] ss:$8 sps:$4 sm:$0xff]  }
  0x6e   :  { %928 = vmatpush1.bf16.msra.mxu0 %v1745_v34  ;;  %881 = vmatpush1.bf16.msra.mxu1 %v1868_v17  ;;  %v1892_v34 = vld [vmem:[#allocation5 + $0xf0] ss:$8 sps:$4 sm:$0xff]   ;;  %v1859_v17 = vld [vmem:[#allocation5 + $0x394] ss:$8 sps:$4 sm:$0xff]  }
  0x6f   :  { %929 = vmatprep.subr.bf16.mxu0 %v1746_v37  ;;  %882 = vmatprep.subr.bf16.mxu1 %v1872_v19  ;;  %v1896_v37 = vld [vmem:[#allocation7 + $0x40] sm:$0xff]  }
  0x70   :  { %v1865_v19 = vld [vmem:[#allocation5 + $0x3a4] ss:$8 sps:$4 sm:$0xff]  }
  0x72   :  { %930 = vmatpush1.bf16.msra.mxu0 %v1748_v38  ;;  %883 = vmatpush1.bf16.msra.mxu1 %v1874_v22  ;;  %v1785_v38 = vld [vmem:[#allocation5 + $0x2b0] ss:$8 sps:$4 sm:$0xff]  }
  0x73   :  { %931 = vmatprep.subr.bf16.mxu0 %v1749_v40  ;;  %884 = vmatprep.subr.bf16.mxu1 %v1878_v23  ;;  %v1897_v40 = vld [vmem:[#allocation7] sm:$0xff]   ;;  %v1869_v22 = vld [vmem:[#allocation5 + $0x3b0] ss:$8 sps:$4 sm:$0xff]  }
  0x74   :  { %v1877_v23 = vld [vmem:[#allocation5 + $0x3c4] ss:$8 sps:$4 sm:$0xff]  }
  0x76   :  { %932 = vmatpush1.bf16.msra.mxu0 %v1751_v43  ;;  %885 = vmatpush1.bf16.msra.mxu1 %v1880_v26  ;;  %v1788_v43 = vld [vmem:[#allocation5 + $0x2c0] ss:$8 sps:$4 sm:$0xff]   ;;  %v1881_v26 = vld [vmem:[#allocation5 + $0x3d0] ss:$8 sps:$4 sm:$0xff]  }
  0x77   :  { %944 = vmatprep.subr.bf16.mxu0 %v1754_v45  ;;  %886 = vmatprep.subr.bf16.mxu1 %v1884_v28  ;;  %v1899_v45 = vld [vmem:[#allocation7 + $0x8] sm:$0xff]  }
  0x78   :  { %v1887_v28 = vld [vmem:[#allocation5 + $0x3e0] ss:$8 sps:$4 sm:$0xff]  }
  0x79   :  { %934 = vmatmul.mubr.bf16.vlgmr.msra.gmra.mrb[0].mxu0 %v84_v51  ;;  %v1794_v51 = vld [vmem:[#allocation5 + $0x2e0] ss:$8 sps:$4 sm:$0xff]  }
  0x7a   :  { %945 = vmatpush1.bf16.msra.mxu0 %v1752_v52  ;;  %976 = vmatprep.mubr.bf16.mxu0 %v87_v54  ;;  %v1799_v52 = vld [vmem:[#allocation5 + $0x2f4] ss:$8 sps:$4 sm:$0xff]   ;;  %v1904_v54 = vld [vmem:[#allocation7 + $0x60] sm:$0xff]  }
  0x7b   :  { %946 = vmatprep.subr.bf16.mxu0 %v1757_v53  ;;  %887 = vmatpush1.bf16.msra.mxu1 %v1886_v30  ;;  %v1903_v53 = vld [vmem:[#allocation7 + $0x18] sm:$0xff]  }
  0x7c   :  { %888 = vmatprep.subr.bf16.mxu1 %v1890_v31  ;;  %v1893_v30 = vld [vmem:[#allocation5 + $0x3f0] ss:$8 sps:$4 sm:$0xff]  }
  0x7d   :  { %v72_v31 = vld [vmem:[#allocation2 + $0x30] sm:$0xff] }
  0x7e   :  { %947 = vmatpush1.bf16.msra.mxu0 %v1755_v57  ;;  %v70_v57 = vld [vmem:[#allocation2 + $0x20] sm:$0xff] }
  0x7f   :  { %948 = vmatprep.subr.bf16.mxu0 %v1760_v58  ;;  %889 = vmatpush1.bf16.msra.mxu1 %v1892_v34  ;;  %v78_v58 = vld [vmem:[#allocation2 + $0x60] sm:$0xff]  ;;  %v1906_v34 = vld [vmem:[#allocation7 + $0x68] sm:$0xff]  }
  0x80   :  { %1613 = vmatprep.subr.bf16.mxu1 %v1896_v37  ;;  %v1909_v37 = vld [vmem:[#allocation7 + $0x30] sm:$0xff]  }
  0x82   :  { %949 = vmatpush1.bf16.msra.mxu0 %v1758_v61  ;;  %891 = vmatmul.mubr.bf16.vlgmr.msra.gmra.mrb[0].mxu1 %v82_v41  ;;  %v1905_v61 = vld [vmem:[#allocation7 + $0x20] sm:$0xff]  }
  0x83   :  { %950 = vmatprep.subr.bf16.mxu0 %v1763_v62  ;;  %1614 = vmatpush3.bf16.msra.mxu1 %v1897_v40  ;;  %v86_v62 = vpack.c.bf16 %v78_v58, %v70_v57  ;;  %v2034_v40 = vmov 0.0  }
  0x84   :  { %1615 = vmatprep.subr.bf16.mxu1 %v1898_v42 }
  0x86   :  { %951 = vmatpush1.bf16.msra.mxu0 %v1761_v1  ;;  %v1811_v1 = vld [vmem:[#allocation5 + $0x314] ss:$8 sps:$4 sm:$0xff]  }
  0x87   :  { %952 = vmatprep.subr.bf16.mxu0 %v1766_v2  ;;  %1616 = vmatpush3.bf16.msra.mxu1 %v1899_v45  ;;  %v1809_v2 = vld [vmem:[#allocation5 + $0x310] ss:$8 sps:$4 sm:$0xff]  }
  0x88   :  { %1617 = vmatprep.subr.bf16.mxu1 %v1900_v46 }
  0x8a   :  { %953 = vmatpush1.bf16.msra.mxu0 %v1764_v5  ;;  %v1823_v5 = vld [vmem:[#allocation5 + $0x334] ss:$8 sps:$4 sm:$0xff]  }
  0x8b   :  { %954 = vmatprep.subr.bf16.mxu0 %v1769_v6  ;;  %1618 = vmatpush3.bf16.msra.mxu1 %v1901_v49  ;;  %v1821_v6 = vld [vmem:[#allocation5 + $0x330] ss:$8 sps:$4 sm:$0xff]  }
  0x8c   :  { %1619 = vmatprep.subr.bf16.mxu1 %v1902_v50 }
  0x8e   :  { %955 = vmatpush1.bf16.msra.mxu0 %v1767_v9  ;;  %v1835_v9 = vld [vmem:[#allocation5 + $0x354] ss:$8 sps:$4 sm:$0xff]  }
  0x8f   :  { %956 = vmatprep.subr.bf16.mxu0 %v1772_v10  ;;  %1620 = vmatpush3.bf16.msra.mxu1 %v1903_v53  ;;  %v1833_v10 = vld [vmem:[#allocation5 + $0x350] ss:$8 sps:$4 sm:$0xff]  }
  0x90   :  { %1621 = vmatprep.subr.bf16.mxu1 %v1904_v54 }
  0x92   :  { %957 = vmatpush1.bf16.msra.mxu0 %v1770_v13  ;;  %v1847_v13 = vld [vmem:[#allocation5 + $0x374] ss:$8 sps:$4 sm:$0xff]  }
  0x93   :  { %958 = vmatprep.subr.bf16.mxu0 %v1775_v16  ;;  %1622 = vmatpush3.bf16.msra.mxu1 %v1905_v61  ;;  %v1851_v16 = vld [vmem:[#allocation5 + $0x380] ss:$8 sps:$4 sm:$0xff]   ;;  %v1914_v61 = vld [vmem:[%s2183_s3 + $0x10] sm:$0xff]  }
  0x94   :  { %1623 = vmatprep.subr.bf16.mxu1 %v1906_v34 }
  0x96   :  { %959 = vmatpush1.bf16.msra.mxu0 %v1773_v20  ;;  %v1863_v20 = vld [vmem:[#allocation5 + $0x3a0] ss:$8 sps:$4 sm:$0xff]  }
  0x97   :  { %960 = vmatprep.subr.bf16.mxu0 %v1778_v21  ;;  %v1871_v21 = vld [vmem:[#allocation5 + $0x3b4] ss:$8 sps:$4 sm:$0xff]   ;;  %1624 = vmatpush3.bf16.msra.mxu1 %v1907_v35 }
  0x98   :  { %1625 = vmatprep.subr.bf16.mxu1 %v1908_v36 }
  0x9a   :  { %961 = vmatpush1.bf16.msra.mxu0 %v1776_v24  ;;  %v1875_v24 = vld [vmem:[#allocation5 + $0x3c0] ss:$8 sps:$4 sm:$0xff]  }
  0x9b   :  { %962 = vmatprep.subr.bf16.mxu0 %v1781_v25  ;;  %v1883_v25 = vld [vmem:[#allocation5 + $0x3d4] ss:$8 sps:$4 sm:$0xff]   ;;  %1626 = vmatpush3.bf16.msra.mxu1 %v1909_v37 }
  0x9e   :  { %963 = vmatpush1.bf16.msra.mxu0 %v1779_v27  ;;  %v1889_v27 = vld [vmem:[#allocation5 + $0x3e4] ss:$8 sps:$4 sm:$0xff]  }
  0x9f   :  { %964 = vmatprep.subr.bf16.mxu0 %v1784_v29  ;;  %v1895_v29 = vld [vmem:[#allocation5 + $0x3f4] ss:$8 sps:$4 sm:$0xff]  }
  0xa2   :  { %965 = vmatpush1.bf16.msra.mxu0 %v1782_v32  ;;  %v80_v32 = vld [vmem:[#allocation2 + $0x70] sm:$0xff] }
  0xa3   :  { %966 = vmatprep.subr.bf16.mxu0 %v1787_v33  ;;  %v88_v33 = vpack.c.bf16 %v80_v32, %v72_v31 }
  0xa6   :  { %967 = vmatpush1.bf16.msra.mxu0 %v1785_v38  ;;  %v1910_v38 = vld [vmem:[#allocation7 + $0x78] sm:$0xff]  }
  0xa7   :  { %968 = vmatprep.subr.bf16.mxu0 %v1790_v39  ;;  %v1911_v39 = vld [vmem:[#allocation7 + $0x38] sm:$0xff]   ;;  %1627 = vmatprep.subr.bf16.mxu1 %v1910_v38 }
  0xa8   :  { %1628 = vmatpush3.bf16.msra.mxu1 %v1911_v39 }
  0xa9   :  { %1649 = vmatprep.subr.bf16.mxu1 %v2034_v40 }
  0xaa   :  { %969 = vmatpush1.bf16.msra.mxu0 %v1788_v43 }
  0xab   :  { %970 = vmatprep.subr.bf16.mxu0 %v1793_v44 }
  0xae   :  { %971 = vmatpush1.bf16.msra.mxu0 %v1791_v47 }
  0xaf   :  { %972 = vmatprep.subr.bf16.mxu0 %v1796_v48 }
  0xb2   :  { %973 = vmatpush1.bf16.msra.mxu0 %v1794_v51 }
  0xb3   :  { %974 = vmatprep.subr.bf16.mxu0 %v1799_v52 }
  0xb6   :  { %975 = vmatpush1.bf16.msra.mxu0 %v1797_v55 }
  0xb7   :  { %987 = vmatprep.subr.bf16.mxu0 %v1805_v56 }
  0xb9   :  { %977 = vmatmul.mubr.bf16.vlgmr.msra.gmra.mrb[0].mxu0 %v86_v62  ;;  %v1915_v62 = vld [vmem:[%s2183_s3 + $0x18] sm:$0xff]  }
  0xba   :  { %988 = vmatpush1.bf16.msra.mxu0 %v1803_v63  ;;  %1019 = vmatprep.mubr.bf16.mxu0 %v89_v0  ;;  %v1916_v63 = vld [vmem:[%s2183_s3 + $0x20] sm:$0xff]   ;;  %v1917_v0 = vld [vmem:[%s2183_s3 + $0x28] sm:$0xff]  }
  0xbb   :  { %989 = vmatprep.subr.bf16.mxu0 %v1811_v1  ;;  %v1918_v1 = vld [vmem:[%s2183_s3 + $0x30] sm:$0xff]  }
  0xbe   :  { %990 = vmatpush1.bf16.msra.mxu0 %v1809_v2  ;;  %v1919_v2 = vld [vmem:[%s2183_s3 + $0x38] sm:$0xff]  }
  0xbf   :  { %991 = vmatprep.subr.bf16.mxu0 %v1817_v3 }
  0xc2   :  { %992 = vmatpush1.bf16.msra.mxu0 %v1815_v4 }
  0xc3   :  { %993 = vmatprep.subr.bf16.mxu0 %v1823_v5 }
  0xc6   :  { %994 = vmatpush1.bf16.msra.mxu0 %v1821_v6 }
  0xc7   :  { %995 = vmatprep.subr.bf16.mxu0 %v1829_v7 }
  0xca   :  { %996 = vmatpush1.bf16.msra.mxu0 %v1827_v8 }
  0xcb   :  { %997 = vmatprep.subr.bf16.mxu0 %v1835_v9 }
  0xce   :  { %998 = vmatpush1.bf16.msra.mxu0 %v1833_v10 }
  0xcf   :  { %999 = vmatprep.subr.bf16.mxu0 %v1841_v11  ;;  %v1920_v11 = vld [vmem:[%s2184_s4] sm:$0xff]  }
  0xd2   :  { %1000 = vmatpush1.bf16.msra.mxu0 %v1839_v12 }
  0xd3   :  { %1001 = vmatprep.subr.bf16.mxu0 %v1847_v13  ;;  %v1921_v13 = vld [vmem:[%s2184_s4 + $0x8] sm:$0xff]  }
  0xd6   :  { %1002 = vmatpush1.bf16.msra.mxu0 %v1845_v14  ;;  %v1922_v14 = vld [vmem:[%s2184_s4 + $0x10] sm:$0xff]  }
  0xd7   :  { %1003 = vmatprep.subr.bf16.mxu0 %v1853_v15  ;;  %v1923_v15 = vld [vmem:[%s2184_s4 + $0x18] sm:$0xff]   ;;  %s2036_s4 = smov [#allocation8]  }
  0xda   :  { %1004 = vmatpush1.bf16.msra.mxu0 %v1851_v16 }
  0xdb   :  { %1005 = vmatprep.subr.bf16.mxu0 %v1859_v17 }
  0xde   :  { %1006 = vmatpush1.bf16.msra.mxu0 %v1857_v18 }
  0xdf   :  { %1007 = vmatprep.subr.bf16.mxu0 %v1865_v19 }
  0xe2   :  { %1008 = vmatpush1.bf16.msra.mxu0 %v1863_v20 }
  0xe3   :  { %1009 = vmatprep.subr.bf16.mxu0 %v1871_v21 }
  0xe6   :  { %1010 = vmatpush1.bf16.msra.mxu0 %v1869_v22 }
  0xe7   :  { %1011 = vmatprep.subr.bf16.mxu0 %v1877_v23  ;;  %v1598_v23 = vld [vmem:[%s2185_s5] ss:$0 sm:$0xff]  ;;  %s1433_s5 = sshll.u32 %s2036_s4, 4  ;;  %s1434_s5 = int_to_ptr.vmem [resolvable:$true] %s1433_s5 }
  0xe8   :  { %s1998_s2 = scalar_lea.vmem %s1434_s5, 128  ;;  %p2003_p11 = scmp.lt.s32.totalorder %s1434_s5, %s1434_s5 }
  0xe9   :  { %p1999_p10 = scmp.ne.s32.totalorder %s1434_s5, %s1998_s2  ;;  %p2004_p12 = scmp.lt.s32.totalorder %s1998_s2, %s1998_s2 }
  0xea   :  { %1012 = vmatpush1.bf16.msra.mxu0 %v1875_v24 }
  0xeb   :  { %1013 = vmatprep.subr.bf16.mxu0 %v1883_v25  ;;  %p2005_p13 = por %p2004_p12, %p2003_p11 }
  0xed   :  { %p2006_p0 = pnand %p2005_p13, %p1999_p10 }
  0xee   :  { %1014 = vmatpush1.bf16.msra.mxu0 %v1881_v26 }
  0xef   :  { %1015 = vmatprep.subr.bf16.mxu0 %v1889_v27 }
  0xf2   :  { %1016 = vmatpush1.bf16.msra.mxu0 %v1887_v28 }
  0xf3   :  { %1017 = vmatprep.subr.bf16.mxu0 %v1895_v29 }
  0xf6   :  { %1018 = vmatpush1.bf16.msra.mxu0 %v1893_v30 }
  0xf9   :  { %1020 = vmatmul.mubr.bf16.vlgmr.msra.gmra.mrb[0].mxu0 %v88_v33 }
 0x155   :  { %v892_v41 = vpop.f32.mrb[0].mxu1 }
 0x156   :  { %v894_v42 = vpop.f32.mrb[1].mxu1 }
 0x157   :  { %v896_v43 = vpop.f32.mrb[2].mxu1 }
 0x158   :  { %v898_v44 = vpop.f32.mrb[3].mxu1 }
 0x1cc   :  { %v1021_v45 = vpop.f32.mrb[0].mxu0 }
 0x1cd   :  { %v1681_v46 = vadd.f32 %v1021_v45, %v892_v41  ;;  %v1023_v47 = vpop.f32.mrb[1].mxu0 }
 0x1ce   :  { %v1682_v48 = vadd.f32 %v1023_v47, %v894_v42  ;;  %v1025_v49 = vpop.f32.mrb[2].mxu0 }
 0x1cf   :  { %v1683_v50 = vadd.f32 %v1025_v49, %v896_v43  ;;  %v1027_v51 = vpop.f32.mrb[3].mxu0  ;;  %v1030_v53 = vmax.f32 %v1681_v46, 0.0 }
 0x1d0   :  { %v1684_v52 = vadd.f32 %v1027_v51, %v898_v44  ;;  %v1031_v55 = vmax.f32 %v1682_v48, 0.0 }
 0x1d1   :  { %v1032_v54 = vmax.f32 %v1683_v50, 0.0 }
 0x1d2   :  { %v1033_v56 = vmax.f32 %v1684_v52, 0.0 }
 0x1d3   :  { %v1034_v57 = vpack.c.bf16 %v1032_v54, %v1030_v53 }
 0x1d4   :  { %v1035_v58 = vpack.c.bf16 %v1033_v56, %v1031_v55 }
 0x1d6   :  { %1196 = vmatprep.mubr.bf16.mxu1 %v1035_v58 }
 0x1d7   :  { %1197 = vmatmul.mubr.bf16.vlgmr.msra.gmra.mrb[4].mxu1 %v1034_v57 }
 0x1d8   :  { %1650 = vmatpush3.bf16.msra.mxu1 %v1912_v59  ;;  %1665 = vmatprep.mubr.msk.bf16.mxu1 %vm2035_vm0, %v2034_v40 }
 0x1d9   :  { %1651 = vmatprep.subr.bf16.mxu1 %v2034_v40 }
 0x1dc   :  { %1652 = vmatpush3.bf16.msra.mxu1 %v1913_v60 }
 0x1dd   :  { %1653 = vmatprep.subr.bf16.mxu1 %v2034_v40 }
 0x1e0   :  { %1654 = vmatpush3.bf16.msra.mxu1 %v1914_v61 }
 0x1e1   :  { %1655 = vmatprep.subr.bf16.mxu1 %v2034_v40 }
 0x1e4   :  { %1656 = vmatpush3.bf16.msra.mxu1 %v1915_v62 }
 0x1e5   :  { %1657 = vmatprep.subr.bf16.mxu1 %v2034_v40 }
 0x1e8   :  { %1658 = vmatpush3.bf16.msra.mxu1 %v1916_v63 }
 0x1e9   :  { %1659 = vmatprep.subr.bf16.mxu1 %v2034_v40 }
 0x1ec   :  { %1660 = vmatpush3.bf16.msra.mxu1 %v1917_v0 }
 0x1ed   :  { %1661 = vmatprep.subr.bf16.mxu1 %v2034_v40 }
 0x1f0   :  { %1662 = vmatpush3.bf16.msra.mxu1 %v1918_v1 }
 0x1f1   :  { %1663 = vmatprep.subr.bf16.mxu1 %v2034_v40 }
 0x1f4   :  { %1664 = vmatpush3.bf16.msra.mxu1 %v1919_v2 }
 0x1f5   :  { %1669 = vmatprep.subr.bf16.mxu1 %v2034_v40 }
 0x2aa   :  { %v1629_v3 = vpop.f32.mrb[4].mxu1 }
 0x2ab   :  { %v1630_v4 = vpop.f32.mrb[5].mxu1 }
 0x2ac   :  { %v1631_v5 = vadd.f32 %v1630_v4, %v1629_v3  ;;  %v1632_v6 = vpop.f32.mrb[6].mxu1 }
 0x2ad   :  { %v1633_v7 = vpop.f32.mrb[7].mxu1 }
 0x2ae   :  { %v1634_v8 = vadd.f32 %v1633_v7, %v1632_v6  ;;  %v1205_v9 = vmax.f32 %v1631_v5, 0.0 }
 0x2b0   :  { %v1206_v10 = vmax.f32 %v1634_v8, 0.0 }
 0x2b2   :  { %v1207_v12 = vpack.c.bf16 %v1206_v10, %v1205_v9 }
 0x2b4   :  { %1666 = vmatmul.mubr.bf16.vlgmr.msra.gmra.mrb[8].mxu1 %v1207_v12 }
 0x2b5   :  { %1670 = vmatpush3.bf16.msra.mxu1 %v1920_v11  ;;  %1677 = vmatprep.mubr.msk.bf16.mxu1 %vm2035_vm0, %v2034_v40 }
 0x2b6   :  { %1671 = vmatprep.subr.bf16.mxu1 %v2034_v40 }
 0x2b9   :  { %1672 = vmatpush3.bf16.msra.mxu1 %v1921_v13 }
 0x2ba   :  { %1673 = vmatprep.subr.bf16.mxu1 %v2034_v40 }
 0x2bd   :  { %1674 = vmatpush3.bf16.msra.mxu1 %v1922_v14 }
 0x2be   :  { %1675 = vmatprep.subr.bf16.mxu1 %v2034_v40 }
 0x2c1   :  { %1676 = vmatpush3.bf16.msra.mxu1 %v1923_v15 }
 0x387   :  { %v1306_v16 = vpop.f32.mrb[8].mxu1 }
 0x388   :  { %v1667_v17 = vpop.f32.mrb[9].mxu1  ;;  %v1313_v19 = vmax.f32 %v1306_v16, 0.0 }
 0x389   :  { %v1309_v18 = vpop.f32.mrb[10].mxu1 }
 0x38a   :  { %v1314_v20 = vmax.f32 %v1309_v18, 0.0  ;;  %v1668_v21 = vpop.f32.mrb[11].mxu1 }
 0x38c   :  { %v1315_v22 = vpack.c.bf16 %v1314_v20, %v1313_v19 }
 0x38e   :  { %1678 = vmatmul.mubr.msk.bf16.vlgmr.msra.gmra.mrb[12].mxu1 %vm1355_vm1, %v1315_v22 }
 0x461   :  { %v1393_v24 = vpop.f32.mrb[12].mxu1 }
 0x462   :  { %v1394_v25 = vadd.f32 %v1598_v23, %v1393_v24  ;;  %v1679_v26 = vpop.f32.mrb[13].mxu1 }
 0x463   :  { %v1396_v27 = vpop.f32.mrb[14].mxu1 }
 0x464   :  { %1400 = vmax.xlane.f32.xlu0 %v1394_v25  ;;  %v1680_v28 = vpop.f32.mrb[15].mxu1  ;;  %v1397_v29 = vadd.f32 %v1598_v23, %v1396_v27 }
 0x468   :  { %1402 = vmax.xlane.f32.xlu0 %v1397_v29 }
 0x4f1   :  { %v1401_v30 = vpop.xlane.xlu0 %1400 }
 0x4f2   :  { %v1404_v31 = vsub.f32 %v1394_v25, %v1401_v30 }
 0x4f4   :  { %v1406_v32 = vmul.f32 1.442695, %v1404_v31 }
 0x4f5   :  { %v1403_v33 = vpop.xlane.xlu0 %1402 }
 0x4f6   :  { %1924 = vpow2.f32 %v1406_v32  ;;  %v1405_v34 = vsub.f32 %v1397_v29, %v1403_v33 }
 0x4f8   :  { %v1408_v35 = vmul.f32 1.442695, %v1405_v34 }
 0x4fa   :  { %1926 = vpow2.f32 %v1408_v35 }
 0x500   :  { %v1925_v36 = vpop.eup %1924 }
 0x501   :  { %1410 = vadd.xlane.f32.xlu1 %v1925_v36 }
 0x504   :  { %v1927_v37 = vpop.eup %1926 }
 0x505   :  { %1412 = vadd.xlane.f32.xlu1 %v1927_v37 }
 0x58e   :  { %v1411_v38 = vpop.xlane.xlu1 %1410 }
 0x58f   :  { %1928 = vrcp.f32 %v1411_v38 }
 0x592   :  { %v1413_v39 = vpop.xlane.xlu1 %1412 }
 0x593   :  { %1930 = vrcp.f32 %v1413_v39 }
 0x599   :  { %v1929_v40 = vpop.eup %1928 }
 0x59a   :  { %v1415_v42 = vmul.f32 %v1929_v40, %v1925_v36 }
 0x59d   :  { %v1931_v41 = vpop.eup %1930 }
 0x59e   :  { %v1417_v43 = vmul.f32 %v1931_v41, %v1927_v37 }
 0x5a0   :  { %v1611_v44 = vpack.c.bf16 %v1417_v43, %v1415_v42 }
 0x5a2   :  { %1612 = vst [vmem:[#allocation8] sm:$0xff] %v1611_v44  }
 0x5a3   :  { %2009 = shalt.err (!%p2006_p0)
}
 0x5a4   :  { %s2010_s14 = scalar_lea.hbm %s2186_s6, 128 }
 0x5a5   :  { %p2011_p1 = scmp.ne.s32.totalorder %s2186_s6, %s2010_s14  ;;  %p2014_p2 = scmp.lt.u32.totalorder %s2010_s14, %s2186_s6 }
 0x5a7   :  { %p2016_p3 = pnand %p2014_p2, %p2011_p1 }
 0x5a9   :  { %2019 = shalt.err (!%p2016_p3)
}
 0x5aa   :  { %1439 = dma.vmem_to_hbm [thread:$0]  %s1434_s5, 128, %s2186_s6, [#allocation4], %s2031_s21, %s2031_s21, %s2033_s0  }
 0x5ab   :  { %2024 = dma.done.wait [#allocation4], 128  }
 0x5ac   :  { %2025 = vsyncadd [#allocation4], 4294967168 }
 0x5ad   :  { %1443 = vsyncpa [#allocation3], 1 }
 0x5ae   :  { %1444 = vsyncpa [#allocation6], 1 }
 0x5af   :  { %1445 = vsyncpa [#allocation4], 1 }

</bundles_post_ra>
